<compile_context>
chip_gen: v7x
topology: tpu7x:2x2x1
jax: 0.10.0
libtpu: 0.0.40
codegen_flags: <defaults>
</compile_context>

<pallas_src>
import math
import functools

import jax
import jax.numpy as jnp
from jax.experimental import pallas as pl
from jax.experimental.pallas import tpu as pltpu


# ----------------------------------------------------------------------------
# Fused forward kernel: QK-fused projection + V projection + per-head attention
# + precomposed fc, all in registers (no VMEM scratch).
# ----------------------------------------------------------------------------
def _fused_mha_kernel(qkv_ref, w_ref, b_ref, o_ref, *, B, S, H, heads, scale):
    dh = H // heads
    BS = B * S
    inv_scale = 1.0 / scale

    xin = qkv_ref[...].astype(jnp.float32)      # (3*BS, H) = [q; k; v]
    w = w_ref[...].astype(jnp.float32)          # (3*H, H)  = [w_q; w_v; w_fc2]
    b = b_ref[...].astype(jnp.float32)          # (3, H)    = [b_q; b_v; b_fc2]

    w_q = w[0:H]                                # sublane-aligned static slices
    w_v = w[H:2 * H]
    w_fc2 = w[2 * H:3 * H]
    b_q = b[0:1]
    b_v = b[1:2]
    b_fc2 = b[2:3]

    # Fused Q+K projection: both use w_q / b_q (PyTorch forward quirk), so a
    # single (2*BS, H) x (H, H) matmul covers them.  V gets its own matmul.
    qk = jnp.dot(xin[0:2 * BS], w_q, preferred_element_type=jnp.float32) + b_q
    V = jnp.dot(xin[2 * BS:3 * BS], w_v, preferred_element_type=jnp.float32) + b_v

    Q3 = qk[0:BS].reshape(B, S, H)              # row split at BS=16 (8-aligned)
    K3 = qk[BS:2 * BS].reshape(B, S, H)
    V3 = V.reshape(B, S, H)

    # Per-head attention, batched over B via dot_general batch dims; heads
    # fully unrolled (heads = 4).  Head outputs stay in vregs and are
    # concatenated -> no ctx scratch, no masked partial-lane stores.
    ctx_heads = []
    for h in range(heads):
        lo = h * dh
        qh = Q3[:, :, lo:lo + dh]               # (B, S, dh)
        kh = K3[:, :, lo:lo + dh]
        vh = V3[:, :, lo:lo + dh]
        scores = jax.lax.dot_general(
            qh, kh, dimension_numbers=(((2,), (2,)), ((0,), (0,))),
            preferred_element_type=jnp.float32) * inv_scale      # (B, S, S)
        m = jnp.max(scores, axis=-1, keepdims=True)
        e = jnp.exp(scores - m)
        p = e / jnp.sum(e, axis=-1, keepdims=True)               # exact divide
        ctx_heads.append(jax.lax.dot_general(
            p, vh, dimension_numbers=(((2,), (1,)), ((0,), (0,))),
            preferred_element_type=jnp.float32))                 # (B, S, dh)

    ctx = jnp.concatenate(ctx_heads, axis=-1).reshape(BS, H)     # (BS, H)

    # Doubled fc precomposed in the wrapper -> one matmul here.
    out = jnp.dot(ctx, w_fc2, preferred_element_type=jnp.float32) + b_fc2
    o_ref[...] = out.astype(o_ref.dtype)


# ----------------------------------------------------------------------------
# Full forward pass of MultiHeadedAttentionTest (single pallas_call), jitted.
# ----------------------------------------------------------------------------
@functools.partial(jax.jit, static_argnums=(4,))
def multi_headed_attention_test_fwd(query, key, value, params, h_heads):
    B, S, H = query.shape
    dh = H // h_heads
    scale = math.sqrt(float(dh))
    BS = B * S

    # Pack the three activation operands into one slab -> one input DMA.
    qkv = jnp.concatenate(
        [query.reshape(BS, H), key.reshape(BS, H), value.reshape(BS, H)], axis=0)

    # Precompose the doubled fc: fc(fc(x)) == x @ (w_fc@w_fc) + (b_fc@w_fc + b_fc).
    w_fc2 = params["w_fc"] @ params["w_fc"]
    b_fc2 = params["b_fc"] @ params["w_fc"] + params["b_fc"]

    # Pack weights / biases into one slab each (8-aligned row offsets).
    w_all = jnp.concatenate([params["w_q"], params["w_v"], w_fc2], axis=0)  # (3H, H)
    b_all = jnp.stack([params["b_q"], params["b_v"], b_fc2], axis=0)        # (3, H)

    kern = functools.partial(_fused_mha_kernel, B=B, S=S, H=H,
                             heads=h_heads, scale=scale)

    out = pl.pallas_call(
        kern,
        out_shape=jax.ShapeDtypeStruct((BS, H), query.dtype),
        grid=(1,),
        in_specs=[
            pl.BlockSpec((3 * BS, H), lambda i: (0, 0)),   # [q; k; v]
            pl.BlockSpec((3 * H, H), lambda i: (0, 0)),    # [w_q; w_v; w_fc2]
            pl.BlockSpec((3, H), lambda i: (0, 0)),        # [b_q; b_v; b_fc2]
        ],
        out_specs=pl.BlockSpec((BS, H), lambda i: (0, 0)),
        compiler_params=pltpu.CompilerParams(
            dimension_semantics=("arbitrary",)),
    )(qkv, w_all, b_all)

    return out.reshape(B, S, H)


# ----------------------------------------------------------------------------
# Pure-JAX reference (faithful: two separate fc applies, K projected with w_q)
# ----------------------------------------------------------------------------
def reference_fwd(query, key, value, params, h_heads):
    B, S, H = query.shape
    dh = H // h_heads
    scale = math.sqrt(float(dh))

    def lin(x, w, b):
        return x @ w + b

    Q = lin(query, params["w_q"], params["b_q"])
    K = lin(key, params["w_q"], params["b_q"])
    V = lin(value, params["w_v"], params["b_v"])
    Qh = Q.reshape(B, S, h_heads, dh).transpose(0, 2, 1, 3)
    Kh = K.reshape(B, S, h_heads, dh).transpose(0, 2, 1, 3)
    Vh = V.reshape(B, S, h_heads, dh).transpose(0, 2, 1, 3)
    scores = jnp.einsum("bhqd,bhkd->bhqk", Qh, Kh) / scale
    p = jax.nn.softmax(scores, axis=-1)
    ctx = jnp.einsum("bhqk,bhkd->bhqd", p, Vh)
    x = ctx.transpose(0, 2, 1, 3).reshape(B, S, H)
    x = lin(x, params["w_fc"], params["b_fc"])
    x = lin(x, params["w_fc"], params["b_fc"])
    return x


# ----------------------------------------------------------------------------
def init_params(key, hidden_dim):
    # Deterministic init mirroring nn.Linear's U(-1/sqrt(in), 1/sqrt(in)).
    bound = 1.0 / math.sqrt(hidden_dim)
    ks = jax.random.split(key, 8)

    def u(k, shape):
        return jax.random.uniform(k, shape, jnp.float32, -bound, bound)

    return {
        "w_q": u(ks[0], (hidden_dim, hidden_dim)), "b_q": u(ks[1], (hidden_dim,)),
        "w_k": u(ks[2], (hidden_dim, hidden_dim)), "b_k": u(ks[3], (hidden_dim,)),  # unused (as in forward)
        "w_v": u(ks[4], (hidden_dim, hidden_dim)), "b_v": u(ks[5], (hidden_dim,)),
        "w_fc": u(ks[6], (hidden_dim, hidden_dim)), "b_fc": u(ks[7], (hidden_dim,)),
    }


if __name__ == "__main__":
    B, S, HIDDEN, HEADS = 2, 8, 32, 4

    root = jax.random.PRNGKey(0)
    kp, kq, kk, kv = jax.random.split(root, 4)
    params = init_params(kp, HIDDEN)

    query = jax.random.normal(kq, (B, S, HIDDEN), jnp.float32)
    key = jax.random.normal(kk, (B, S, HIDDEN), jnp.float32)
    value = jax.random.normal(kv, (B, S, HIDDEN), jnp.float32)

    out = multi_headed_attention_test_fwd(query, key, value, params, HEADS)
    out = jax.block_until_ready(out)

    ref = reference_fwd(query, key, value, params, HEADS)
    assert out.shape == (B, S, HIDDEN)
    assert jnp.allclose(out, ref, atol=1e-5, rtol=1e-5), "mismatch vs reference"

    print("KERNEL_OK")
</pallas_src>

<mosaic_0001>
module attributes {stable_mosaic.version = 11 : i64} {
  func.func @_fused_mha_kernel(%arg0: i32, %arg1: memref<48x32xf32, #tpu.memory_space<vmem>>, %arg2: memref<96x32xf32, #tpu.memory_space<vmem>>, %arg3: memref<3x32xf32, #tpu.memory_space<vmem>>, %arg4: memref<16x32xf32, #tpu.memory_space<vmem>>) attributes {dimension_semantics = [#tpu.dimension_semantics<arbitrary>], iteration_bounds = array<i64: 1>, scalar_prefetch = 0 : i64, scratch_operands = 0 : i64, tpu.core_type = #tpu.core_type<tc>, window_params = [{pipeline_mode = #tpu.pipeline_mode<synchronous>, transform_indices = @transform_0, window_bounds = array<i64: 48, 32>}, {pipeline_mode = #tpu.pipeline_mode<synchronous>, transform_indices = @transform_1, window_bounds = array<i64: 96, 32>}, {pipeline_mode = #tpu.pipeline_mode<synchronous>, transform_indices = @transform_2, window_bounds = array<i64: 3, 32>}, {pipeline_mode = #tpu.pipeline_mode<synchronous>, transform_indices = @transform_3, window_bounds = array<i64: 16, 32>}]} {
    %c0 = arith.constant 0 : index
    %c0_0 = arith.constant 0 : index
    %0 = vector.load %arg1[%c0, %c0_0] : memref<48x32xf32, #tpu.memory_space<vmem>>, vector<48x32xf32>
    %c0_1 = arith.constant 0 : index
    %c0_2 = arith.constant 0 : index
    %1 = vector.load %arg2[%c0_1, %c0_2] : memref<96x32xf32, #tpu.memory_space<vmem>>, vector<96x32xf32>
    %c0_3 = arith.constant 0 : index
    %c0_4 = arith.constant 0 : index
    %2 = vector.load %arg3[%c0_3, %c0_4] : memref<3x32xf32, #tpu.memory_space<vmem>>, vector<3x32xf32>
    %3 = vector.extract_strided_slice %1 {offsets = [0, 0], sizes = [32, 32], strides = [1, 1]} : vector<96x32xf32> to vector<32x32xf32>
    %4 = vector.extract_strided_slice %1 {offsets = [32, 0], sizes = [32, 32], strides = [1, 1]} : vector<96x32xf32> to vector<32x32xf32>
    %5 = vector.extract_strided_slice %1 {offsets = [64, 0], sizes = [32, 32], strides = [1, 1]} : vector<96x32xf32> to vector<32x32xf32>
    %6 = vector.extract_strided_slice %2 {offsets = [0, 0], sizes = [1, 32], strides = [1, 1]} : vector<3x32xf32> to vector<1x32xf32>
    %7 = vector.extract_strided_slice %2 {offsets = [1, 0], sizes = [1, 32], strides = [1, 1]} : vector<3x32xf32> to vector<1x32xf32>
    %8 = vector.extract_strided_slice %2 {offsets = [2, 0], sizes = [1, 32], strides = [1, 1]} : vector<3x32xf32> to vector<1x32xf32>
    %9 = vector.extract_strided_slice %0 {offsets = [0, 0], sizes = [32, 32], strides = [1, 1]} : vector<48x32xf32> to vector<32x32xf32>
    %cst = arith.constant dense<0.000000e+00> : vector<32x32xf32>
    %10 = tpu.matmul %9, %3, %cst {dimension_numbers = #tpu.dot_dimension_numbers<[1], [0], [0], [1], [0, 0, 1, 1], [], []>} : vector<32x32xf32>, vector<32x32xf32>, vector<32x32xf32> -> vector<32x32xf32>
    %11 = vector.broadcast %6 : vector<1x32xf32> to vector<32x32xf32>
    %12 = arith.addf %10, %11 : vector<32x32xf32>
    %13 = vector.extract_strided_slice %0 {offsets = [32, 0], sizes = [16, 32], strides = [1, 1]} : vector<48x32xf32> to vector<16x32xf32>
    %cst_5 = arith.constant dense<0.000000e+00> : vector<16x32xf32>
    %14 = tpu.matmul %13, %4, %cst_5 {dimension_numbers = #tpu.dot_dimension_numbers<[1], [0], [0], [1], [0, 0, 1, 1], [], []>} : vector<16x32xf32>, vector<32x32xf32>, vector<16x32xf32> -> vector<16x32xf32>
    %15 = vector.broadcast %7 : vector<1x32xf32> to vector<16x32xf32>
    %16 = arith.addf %14, %15 : vector<16x32xf32>
    %17 = vector.extract_strided_slice %12 {offsets = [0, 0], sizes = [16, 32], strides = [1, 1]} : vector<32x32xf32> to vector<16x32xf32>
    %18 = vector.shape_cast %17 : vector<16x32xf32> to vector<2x8x32xf32>
    %19 = vector.extract_strided_slice %12 {offsets = [16, 0], sizes = [16, 32], strides = [1, 1]} : vector<32x32xf32> to vector<16x32xf32>
    %20 = vector.shape_cast %19 : vector<16x32xf32> to vector<2x8x32xf32>
    %21 = vector.shape_cast %16 : vector<16x32xf32> to vector<2x8x32xf32>
    %22 = vector.extract_strided_slice %18 {offsets = [0, 0, 0], sizes = [2, 8, 8], strides = [1, 1, 1]} : vector<2x8x32xf32> to vector<2x8x8xf32>
    %23 = vector.extract_strided_slice %20 {offsets = [0, 0, 0], sizes = [2, 8, 8], strides = [1, 1, 1]} : vector<2x8x32xf32> to vector<2x8x8xf32>
    %24 = vector.extract_strided_slice %21 {offsets = [0, 0, 0], sizes = [2, 8, 8], strides = [1, 1, 1]} : vector<2x8x32xf32> to vector<2x8x8xf32>
    %cst_6 = arith.constant dense<0.000000e+00> : vector<2x8x8xf32>
    %25 = tpu.matmul %22, %23, %cst_6 {dimension_numbers = #tpu.dot_dimension_numbers<[2], [2], [1], [1], [0, 0, 0, 1, 1, 1], [0], [0]>} : vector<2x8x8xf32>, vector<2x8x8xf32>, vector<2x8x8xf32> -> vector<2x8x8xf32>
    %cst_7 = arith.constant 0.353553385 : f32
    %26 = vector.broadcast %cst_7 : f32 to vector<2x8x8xf32>
    %27 = arith.mulf %25, %26 : vector<2x8x8xf32>
    %cst_8 = arith.constant dense<0xFF800000> : vector<2x8xf32>
    %28 = vector.multi_reduction <maximumf>, %27, %cst_8 [2] : vector<2x8x8xf32> to vector<2x8xf32>
    %29 = vector.shape_cast %28 : vector<2x8xf32> to vector<2x8x1xf32>
    %30 = vector.broadcast %29 : vector<2x8x1xf32> to vector<2x8x8xf32>
    %31 = arith.subf %27, %30 : vector<2x8x8xf32>
    %32 = math.exp %31 : vector<2x8x8xf32>
    %cst_9 = arith.constant dense<0.000000e+00> : vector<2x8xf32>
    %33 = vector.multi_reduction <add>, %32, %cst_9 [2] : vector<2x8x8xf32> to vector<2x8xf32>
    %34 = vector.shape_cast %33 : vector<2x8xf32> to vector<2x8x1xf32>
    %35 = vector.broadcast %34 : vector<2x8x1xf32> to vector<2x8x8xf32>
    %36 = arith.divf %32, %35 : vector<2x8x8xf32>
    %cst_10 = arith.constant dense<0.000000e+00> : vector<2x8x8xf32>
    %37 = tpu.matmul %36, %24, %cst_10 {dimension_numbers = #tpu.dot_dimension_numbers<[2], [1], [1], [2], [0, 0, 0, 1, 1, 2], [0], [0]>} : vector<2x8x8xf32>, vector<2x8x8xf32>, vector<2x8x8xf32> -> vector<2x8x8xf32>
    %38 = vector.extract_strided_slice %18 {offsets = [0, 0, 8], sizes = [2, 8, 8], strides = [1, 1, 1]} : vector<2x8x32xf32> to vector<2x8x8xf32>
    %39 = vector.extract_strided_slice %20 {offsets = [0, 0, 8], sizes = [2, 8, 8], strides = [1, 1, 1]} : vector<2x8x32xf32> to vector<2x8x8xf32>
    %40 = vector.extract_strided_slice %21 {offsets = [0, 0, 8], sizes = [2, 8, 8], strides = [1, 1, 1]} : vector<2x8x32xf32> to vector<2x8x8xf32>
    %cst_11 = arith.constant dense<0.000000e+00> : vector<2x8x8xf32>
    %41 = tpu.matmul %38, %39, %cst_11 {dimension_numbers = #tpu.dot_dimension_numbers<[2], [2], [1], [1], [0, 0, 0, 1, 1, 1], [0], [0]>} : vector<2x8x8xf32>, vector<2x8x8xf32>, vector<2x8x8xf32> -> vector<2x8x8xf32>
    %cst_12 = arith.constant 0.353553385 : f32
    %42 = vector.broadcast %cst_12 : f32 to vector<2x8x8xf32>
    %43 = arith.mulf %41, %42 : vector<2x8x8xf32>
    %cst_13 = arith.constant dense<0xFF800000> : vector<2x8xf32>
    %44 = vector.multi_reduction <maximumf>, %43, %cst_13 [2] : vector<2x8x8xf32> to vector<2x8xf32>
    %45 = vector.shape_cast %44 : vector<2x8xf32> to vector<2x8x1xf32>
    %46 = vector.broadcast %45 : vector<2x8x1xf32> to vector<2x8x8xf32>
    %47 = arith.subf %43, %46 : vector<2x8x8xf32>
    %48 = math.exp %47 : vector<2x8x8xf32>
    %cst_14 = arith.constant dense<0.000000e+00> : vector<2x8xf32>
    %49 = vector.multi_reduction <add>, %48, %cst_14 [2] : vector<2x8x8xf32> to vector<2x8xf32>
    %50 = vector.shape_cast %49 : vector<2x8xf32> to vector<2x8x1xf32>
    %51 = vector.broadcast %50 : vector<2x8x1xf32> to vector<2x8x8xf32>
    %52 = arith.divf %48, %51 : vector<2x8x8xf32>
    %cst_15 = arith.constant dense<0.000000e+00> : vector<2x8x8xf32>
    %53 = tpu.matmul %52, %40, %cst_15 {dimension_numbers = #tpu.dot_dimension_numbers<[2], [1], [1], [2], [0, 0, 0, 1, 1, 2], [0], [0]>} : vector<2x8x8xf32>, vector<2x8x8xf32>, vector<2x8x8xf32> -> vector<2x8x8xf32>
    %54 = vector.extract_strided_slice %18 {offsets = [0, 0, 16], sizes = [2, 8, 8], strides = [1, 1, 1]} : vector<2x8x32xf32> to vector<2x8x8xf32>
    %55 = vector.extract_strided_slice %20 {offsets = [0, 0, 16], sizes = [2, 8, 8], strides = [1, 1, 1]} : vector<2x8x32xf32> to vector<2x8x8xf32>
    %56 = vector.extract_strided_slice %21 {offsets = [0, 0, 16], sizes = [2, 8, 8], strides = [1, 1, 1]} : vector<2x8x32xf32> to vector<2x8x8xf32>
    %cst_16 = arith.constant dense<0.000000e+00> : vector<2x8x8xf32>
    %57 = tpu.matmul %54, %55, %cst_16 {dimension_numbers = #tpu.dot_dimension_numbers<[2], [2], [1], [1], [0, 0, 0, 1, 1, 1], [0], [0]>} : vector<2x8x8xf32>, vector<2x8x8xf32>, vector<2x8x8xf32> -> vector<2x8x8xf32>
    %cst_17 = arith.constant 0.353553385 : f32
    %58 = vector.broadcast %cst_17 : f32 to vector<2x8x8xf32>
    %59 = arith.mulf %57, %58 : vector<2x8x8xf32>
    %cst_18 = arith.constant dense<0xFF800000> : vector<2x8xf32>
    %60 = vector.multi_reduction <maximumf>, %59, %cst_18 [2] : vector<2x8x8xf32> to vector<2x8xf32>
    %61 = vector.shape_cast %60 : vector<2x8xf32> to vector<2x8x1xf32>
    %62 = vector.broadcast %61 : vector<2x8x1xf32> to vector<2x8x8xf32>
    %63 = arith.subf %59, %62 : vector<2x8x8xf32>
    %64 = math.exp %63 : vector<2x8x8xf32>
    %cst_19 = arith.constant dense<0.000000e+00> : vector<2x8xf32>
    %65 = vector.multi_reduction <add>, %64, %cst_19 [2] : vector<2x8x8xf32> to vector<2x8xf32>
    %66 = vector.shape_cast %65 : vector<2x8xf32> to vector<2x8x1xf32>
    %67 = vector.broadcast %66 : vector<2x8x1xf32> to vector<2x8x8xf32>
    %68 = arith.divf %64, %67 : vector<2x8x8xf32>
    %cst_20 = arith.constant dense<0.000000e+00> : vector<2x8x8xf32>
    %69 = tpu.matmul %68, %56, %cst_20 {dimension_numbers = #tpu.dot_dimension_numbers<[2], [1], [1], [2], [0, 0, 0, 1, 1, 2], [0], [0]>} : vector<2x8x8xf32>, vector<2x8x8xf32>, vector<2x8x8xf32> -> vector<2x8x8xf32>
    %70 = vector.extract_strided_slice %18 {offsets = [0, 0, 24], sizes = [2, 8, 8], strides = [1, 1, 1]} : vector<2x8x32xf32> to vector<2x8x8xf32>
    %71 = vector.extract_strided_slice %20 {offsets = [0, 0, 24], sizes = [2, 8, 8], strides = [1, 1, 1]} : vector<2x8x32xf32> to vector<2x8x8xf32>
    %72 = vector.extract_strided_slice %21 {offsets = [0, 0, 24], sizes = [2, 8, 8], strides = [1, 1, 1]} : vector<2x8x32xf32> to vector<2x8x8xf32>
    %cst_21 = arith.constant dense<0.000000e+00> : vector<2x8x8xf32>
    %73 = tpu.matmul %70, %71, %cst_21 {dimension_numbers = #tpu.dot_dimension_numbers<[2], [2], [1], [1], [0, 0, 0, 1, 1, 1], [0], [0]>} : vector<2x8x8xf32>, vector<2x8x8xf32>, vector<2x8x8xf32> -> vector<2x8x8xf32>
    %cst_22 = arith.constant 0.353553385 : f32
    %74 = vector.broadcast %cst_22 : f32 to vector<2x8x8xf32>
    %75 = arith.mulf %73, %74 : vector<2x8x8xf32>
    %cst_23 = arith.constant dense<0xFF800000> : vector<2x8xf32>
    %76 = vector.multi_reduction <maximumf>, %75, %cst_23 [2] : vector<2x8x8xf32> to vector<2x8xf32>
    %77 = vector.shape_cast %76 : vector<2x8xf32> to vector<2x8x1xf32>
    %78 = vector.broadcast %77 : vector<2x8x1xf32> to vector<2x8x8xf32>
    %79 = arith.subf %75, %78 : vector<2x8x8xf32>
    %80 = math.exp %79 : vector<2x8x8xf32>
    %cst_24 = arith.constant dense<0.000000e+00> : vector<2x8xf32>
    %81 = vector.multi_reduction <add>, %80, %cst_24 [2] : vector<2x8x8xf32> to vector<2x8xf32>
    %82 = vector.shape_cast %81 : vector<2x8xf32> to vector<2x8x1xf32>
    %83 = vector.broadcast %82 : vector<2x8x1xf32> to vector<2x8x8xf32>
    %84 = arith.divf %80, %83 : vector<2x8x8xf32>
    %cst_25 = arith.constant dense<0.000000e+00> : vector<2x8x8xf32>
    %85 = tpu.matmul %84, %72, %cst_25 {dimension_numbers = #tpu.dot_dimension_numbers<[2], [1], [1], [2], [0, 0, 0, 1, 1, 2], [0], [0]>} : vector<2x8x8xf32>, vector<2x8x8xf32>, vector<2x8x8xf32> -> vector<2x8x8xf32>
    %86 = tpu.concatenate %37, %53, %69, %85 in 2 : vector<2x8x8xf32>, vector<2x8x8xf32>, vector<2x8x8xf32>, vector<2x8x8xf32> -> vector<2x8x32xf32>
    %87 = vector.shape_cast %86 : vector<2x8x32xf32> to vector<16x32xf32>
    %cst_26 = arith.constant dense<0.000000e+00> : vector<16x32xf32>
    %88 = tpu.matmul %87, %5, %cst_26 {dimension_numbers = #tpu.dot_dimension_numbers<[1], [0], [0], [1], [0, 0, 1, 1], [], []>} : vector<16x32xf32>, vector<32x32xf32>, vector<16x32xf32> -> vector<16x32xf32>
    %89 = vector.broadcast %8 : vector<1x32xf32> to vector<16x32xf32>
    %90 = arith.addf %88, %89 : vector<16x32xf32>
    %c0_27 = arith.constant 0 : index
    %c0_28 = arith.constant 0 : index
    %91 = vector.load %arg4[%c0_27, %c0_28] : memref<16x32xf32, #tpu.memory_space<vmem>>, vector<16x32xf32>
    tpu.vector_store %arg4[%c0_27, %c0_28], %90 {strides = array<i32>} : memref<16x32xf32, #tpu.memory_space<vmem>>, vector<16x32xf32>,
    return
  }
  func.func @transform_0(%arg0: i32) -> (i32, i32) {
    %c0_i32 = arith.constant 0 : i32
    %c0_i32_0 = arith.constant 0 : i32
    %c0_i32_1 = arith.constant 0 : i32
    return %c0_i32, %c0_i32_0 : i32, i32
  }
  func.func @transform_1(%arg0: i32) -> (i32, i32) {
    %c0_i32 = arith.constant 0 : i32
    %c0_i32_0 = arith.constant 0 : i32
    %c0_i32_1 = arith.constant 0 : i32
    return %c0_i32, %c0_i32_0 : i32, i32
  }
  func.func @transform_2(%arg0: i32) -> (i32, i32) {
    %c0_i32 = arith.constant 0 : i32
    %c0_i32_0 = arith.constant 0 : i32
    %c0_i32_1 = arith.constant 0 : i32
    return %c0_i32, %c0_i32_0 : i32, i32
  }
  func.func @transform_3(%arg0: i32) -> (i32, i32) {
    %c0_i32 = arith.constant 0 : i32
    %c0_i32_0 = arith.constant 0 : i32
    %c0_i32_1 = arith.constant 0 : i32
    return %c0_i32, %c0_i32_0 : i32, i32
  }
}

</mosaic_0001>

<bundles_post_ra>
// kernel: multi_headed_attention_test_fwd.1
= control target key start
LH: loop header
LB: loop body
LE: loop exit
PB: predicated region body
PF: predicated region fallthrough
CT: control target
= control target key end

     0   :  { %vm38_vm0 = vcmask 261120   ;;  %s2245_s0 = inlined_call_operand.vmem [shape: f32[48,32], index: 0, kind: input, shape index: {}]   ;;  %s2246_s1 = inlined_call_operand.vmem [shape: f32[96,32], index: 1, kind: input, shape index: {}]   ;;  %s2247_s2 = inlined_call_operand.vmem [shape: f32[3,32], index: 2, kind: input, shape index: {}]   ;;  %s2248_s3 = inlined_call_operand.hbm [shape: f32[16,32], index: 3, kind: output, shape index: {}]  }
   0x1   :  { %v21_v0 = vld [vmem:[%s2246_s1] sm:$0xff]  ;;  %v22_v1 = vld [vmem:[%s2246_s1 + $0x8] sm:$0xff]  ;;  %v23_v2 = vld [vmem:[%s2246_s1 + $0x10] sm:$0xff] }
   0x2   :  { %v1877_v3 = vpack.c.bf16 %v22_v1, %v21_v0  ;;  %v24_v4 = vld [vmem:[%s2246_s1 + $0x18] sm:$0xff]  ;;  %v15_v5 = vld [vmem:[%s2245_s0] sm:$0xff]  ;;  %v26_v8 = vld [vmem:[%s2246_s1 + $0x28] sm:$0xff] }
   0x3   :  { %v1881_v6 = vpack.c.bf16 %v24_v4, %v23_v2  ;;  %1769 = vmatprep.mubr.msk.f32.mxu0 %vm38_vm0, %v15_v5  ;;  %v25_v7 = vld [vmem:[%s2246_s1 + $0x20] sm:$0xff]  ;;  %v27_v9 = vld [vmem:[%s2246_s1 + $0x30] sm:$0xff]  ;;  %v28_v10 = vld [vmem:[%s2246_s1 + $0x38] sm:$0xff] }
   0x4   :  { %1878 = vmatprep.subr.bf16.mxu0 %v1877_v3  ;;  %v1885_v11 = vpack.c.bf16 %v26_v8, %v25_v7  ;;  %v1889_v12 = vpack.c.bf16 %v28_v10, %v27_v9 }
   0x5   :  { %1880 = vmatpush3.bf16.msra.mxu0 %v1877_v3 }
   0x6   :  { %8 = vsyncpa [#allocation3], 0  ;;  %1882 = vmatprep.subr.bf16.mxu0 %v1881_v6  ;;  %1886 = vmatprep.subr.bf16.mxu1 %v1885_v11  ;;  %v16_v13 = vld [vmem:[%s2245_s0 + $0x8] sm:$0xff]  ;;  %v17_v14 = vld [vmem:[%s2245_s0 + $0x10] sm:$0xff]  ;;  %v1967_v18 = vmov 0.0   ;;  %vm1968_vm1 = vmmov 0   ;;  %v34_v19 = vlaneseq }
   0x7   :  { %1888 = vmatpush3.bf16.msra.mxu1 %v1885_v11  ;;  %v18_v15 = vld [vmem:[%s2245_s0 + $0x18] sm:$0xff]  ;;  %v19_v16 = vld [vmem:[%s2245_s0 + $0x20] sm:$0xff]  ;;  %v20_v17 = vld [vmem:[%s2245_s0 + $0x28] sm:$0xff]  ;;  %vm221_vm2 = vcmask 64512   ;;  %s1969_s14 = smov 120   ;;  %s1971_s15 = smov 104  }
   0x8   :  { %1890 = vmatprep.subr.bf16.mxu1 %v1889_v12  ;;  %1783 = vmatprep.mubr.msk.f32.mxu1 %vm38_vm0, %v19_v16  ;;  %v2051_v20 = vshrl.u32 %v34_v19, 7  ;;  %v2057_v22 = vld [vmem:[%s2247_s2] sm:$0x7]  ;;  %s1970_s2 = smov 112   ;;  %s1972_s16 = smov 8   ;;  %vm1568_vm3 = vcmask 130048  }
   0x9   :  { %1884 = vmatpush3.bf16.msra.mxu0 %v1881_v6  ;;  %s1973_s17 = smov 16   ;;  %s1974_s26 = smov 24   ;;  %vm1571_vm4 = vcmask 195584  }
   0xa   :  { %1791 = vmatprep.subr.mxu0 %v1967_v18  ;;  %v36_v21 = vsub.s32 0, %v2051_v20  ;;  %v138_v32 = vsub.s32 1, %v2051_v20 }
   0xb   :  { %1892 = vmatpush3.bf16.msra.mxu1 %v1889_v12 }
   0xc   :  { %1770 = vmatmul.mubr.msk.f32.vlgmr.msra.gmra.mrb[0].mxu0 %vm38_vm0, %v16_v13  ;;  %1786 = vmatprep.subr.mxu1 %v1967_v18  ;;  %v37_v25 = vrot.slane %v2057_v22, %v36_v21  ;;  %v139_v33 = vrot.slane %v2057_v22, %v138_v32 }
   0xd   :  { %1772 = vmatprep.mubr.msk.f32.mxu0 %vm38_vm0, %v17_v14 }
   0xe   :  { %1784 = vmatmul.mubr.msk.f32.vlgmr.msra.gmra.mrb[0].mxu1 %vm38_vm0, %v20_v17 }
   0xf   :  { %1788 = vmatprep.mubr.msk.f32.mxu1 %vm1968_vm1, %v1967_v18 }
  0x10   :  { %1773 = vmatmul.mubr.msk.f32.gmra.mrb[2].mxu0 %vm38_vm0, %v18_v15 }
  0x11   :  { %1793 = vmatprep.mubr.msk.f32.mxu0 %vm1968_vm1, %v1967_v18 }
  0xdf   :  { %v1771_v23 = vpop.f32.mrb[0].mxu0 }
  0xe0   :  { %v117_v24 = vpop.f32.mrb[1].mxu0  ;;  %v2068_v30 = vadd.f32 %v1771_v23, %v37_v25 }
  0xe1   :  { %v2073_v31 = vadd.f32 %v117_v24, %v37_v25  ;;  %v1785_v34 = vpop.f32.mrb[0].mxu1 }
  0xe2   :  { %v2088_v35 = vadd.f32 %v1785_v34, %v139_v33  ;;  %v212_v36 = vpop.f32.mrb[1].mxu1 }
  0xe3   :  { %v1774_v26 = vpop.f32.mrb[2].mxu0  ;;  %v2090_v37 = vadd.f32 %v212_v36, %v139_v33 }
  0xe4   :  { %v2060_v27 = vadd.f32 %v1774_v26, %v37_v25  ;;  %v127_v28 = vpop.f32.mrb[3].mxu0 }
  0xe5   :  { %v2062_v29 = vadd.f32 %v127_v28, %v37_v25 }
  0xe6   :  { %624 = vrot.lane.b32.xlu1 %v2060_v27, %s1969_s14  ;;  %1792 = vmatpush3.xpose.msk.msra.mxu0 %vm221_vm2, %v2060_v27 }
  0xe7   :  { %1787 = vmatpush3.xpose.msk.msra.mxu1 %vm221_vm2, %v2062_v29  ;;  %1801 = vmatprep.subr.mxu0 %v1967_v18 }
  0xe8   :  { %1796 = vmatprep.subr.mxu1 %v1967_v18 }
  0xe9   :  { %1794 = vmatmul.mubr.msk.f32.vlgmr.msra.gmra.mrb[4].mxu0 %vm221_vm2, %v2068_v30 }
  0xea   :  { %544 = vrot.lane.b32.xlu1 %v2073_v31, %s1969_s14  ;;  %1789 = vmatmul.mubr.msk.f32.vlgmr.msra.gmra.mrb[2].mxu1 %vm221_vm2, %v2073_v31 }
  0xeb   :  { %1803 = vmatprep.mubr.msk.f32.mxu0 %vm1968_vm1, %v1967_v18  ;;  %1798 = vmatprep.mubr.msk.f32.mxu1 %vm1968_vm1, %v1967_v18 }
  0xec   :  { %1802 = vmatpush3.msra.mxu0 %v2088_v35  ;;  %1797 = vmatpush3.msra.mxu1 %v2090_v37 }
  0xed   :  { %1811 = vmatprep.subr.mxu0 %v1967_v18  ;;  %1806 = vmatprep.subr.mxu1 %v1967_v18 }
 0x158   :  { %v625_v56 = vpop.permute.xlu1 %624 }
 0x15c   :  { %v545_v57 = vpop.permute.xlu1 %544 }
 0x1bc   :  { %v370_v38 = vpop.f32.mrb[4].mxu0 }
 0x1bd   :  { %v294_v39 = vpop.f32.mrb[2].mxu1  ;;  %v1795_v40 = vpop.f32.mrb[5].mxu0  ;;  %v375_v43 = vmul.f32 0.35355338, %v370_v38 }
 0x1be   :  { %v374_v41 = vmul.f32 0.35355338, %v294_v39  ;;  %v1790_v42 = vpop.f32.mrb[3].mxu1 }
 0x1bf   :  { %v379_v45 = vsel %vm221_vm2, %v375_v43, -inf }
 0x1c0   :  { %v376_v44 = vsel %vm221_vm2, %v374_v41, -inf }
 0x1c1   :  { %377 = vmax.xlane.f32.xlu0 %v376_v44 }
 0x1c5   :  { %380 = vmax.xlane.f32.xlu0 %v379_v45 }
 0x1db   :  { %546 = vrot.lane.b32.xlu0 %v2062_v29, %s1969_s14 }
 0x24e   :  { %v378_v46 = vpop.xlane.xlu0 %377 }
 0x24f   :  { %v382_v47 = vsub.f32 %v374_v41, %v378_v46 }
 0x251   :  { %v384_v50 = vmul.f32 1.442695, %v382_v47 }
 0x252   :  { %v381_v48 = vpop.xlane.xlu0 %380 }
 0x253   :  { %v383_v49 = vsub.f32 %v375_v43, %v381_v48 }
 0x255   :  { %v386_v51 = vmul.f32 1.442695, %v383_v49 }
 0x256   :  { %v547_v1 = vpop.permute.xlu0 %546 }
 0x257   :  { %1911 = vpow2.f32 %v386_v51 }
 0x258   :  { %1913 = vpow2.f32 %v384_v50 }
 0x261   :  { %v1912_v52 = vpop.eup %1911 }
 0x262   :  { %v391_v53 = vsel %vm221_vm2, %v1912_v52, 0.0  ;;  %v1914_v54 = vpop.eup %1913 }
 0x263   :  { %392 = vadd.xlane.f32.xlu1 %v391_v53  ;;  %v388_v55 = vsel %vm221_vm2, %v1914_v54, 0.0 }
 0x267   :  { %389 = vadd.xlane.f32.xlu1 %v388_v55 }
 0x278   :  { %622 = vrot.lane.b32.xlu1 %v2068_v30, %s1969_s14 }
 0x2f0   :  { %v393_v58 = vpop.xlane.xlu1 %392 }
 0x2f1   :  { %1915 = vrcp.f32 %v393_v58 }
 0x2f4   :  { %v390_v59 = vpop.xlane.xlu1 %389 }
 0x2f5   :  { %1917 = vrcp.f32 %v390_v59 }
 0x2f8   :  { %v623_v0 = vpop.permute.xlu1 %622 }
 0x2fb   :  { %v1916_v60 = vpop.eup %1915 }
 0x2fc   :  { %v397_v61 = vmul.f32 %v1916_v60, %v1912_v52 }
 0x2fe   :  { %1804 = vmatmul.mubr.msk.f32.vlgmr.msra.gmra.mrb[6].mxu0 %vm221_vm2, %v397_v61 }
 0x2ff   :  { %v1918_v62 = vpop.eup %1917  ;;  %1812 = vmatpush3.xpose.msk.msra.mxu0 %vm221_vm2, %v625_v56  ;;  %1813 = vmatprep.mubr.msk.f32.mxu0 %vm1968_vm1, %v1967_v18 }
 0x300   :  { %v395_v63 = vmul.f32 %v1918_v62, %v1914_v54  ;;  %1821 = vmatprep.subr.mxu0 %v1967_v18 }
 0x302   :  { %1799 = vmatmul.mubr.msk.f32.vlgmr.msra.gmra.mrb[4].mxu1 %vm221_vm2, %v395_v63  ;;  %1814 = vmatmul.mubr.msk.f32.vlgmr.msra.gmra.mrb[8].mxu0 %vm221_vm2, %v623_v0 }
 0x303   :  { %1807 = vmatpush3.xpose.msk.msra.mxu1 %vm221_vm2, %v547_v1  ;;  %1808 = vmatprep.mubr.msk.f32.mxu1 %vm1968_vm1, %v1967_v18 }
 0x304   :  { %1816 = vmatprep.subr.mxu1 %v1967_v18  ;;  %1823 = vmatprep.mubr.msk.f32.mxu0 %vm1968_vm1, %v1967_v18 }
 0x306   :  { %1809 = vmatmul.mubr.msk.f32.vlgmr.msra.gmra.mrb[6].mxu1 %vm221_vm2, %v545_v57 }
 0x307   :  { %1818 = vmatprep.mubr.msk.f32.mxu1 %vm1968_vm1, %v1967_v18 }
 0x3d1   :  { %v2120_v2 = vpop.f32.mrb[6].mxu0 }
 0x3d2   :  { %v1805_v3 = vpop.f32.mrb[7].mxu0 }
 0x3d5   :  { %v2122_v4 = vpop.f32.mrb[4].mxu1  ;;  %v696_v5 = vpop.f32.mrb[8].mxu0 }
 0x3d6   :  { %v701_v6 = vmul.f32 0.35355338, %v696_v5  ;;  %v1800_v7 = vpop.f32.mrb[5].mxu1  ;;  %v1815_v8 = vpop.f32.mrb[9].mxu0 }
 0x3d8   :  { %v705_v9 = vsel %vm221_vm2, %v701_v6, -inf }
 0x3d9   :  { %706 = vmax.xlane.f32.xlu1 %v705_v9  ;;  %v618_v10 = vpop.f32.mrb[6].mxu1 }
 0x3da   :  { %v700_v11 = vmul.f32 0.35355338, %v618_v10  ;;  %v1810_v12 = vpop.f32.mrb[7].mxu1 }
 0x3dc   :  { %v702_v13 = vsel %vm221_vm2, %v700_v11, -inf }
 0x3dd   :  { %703 = vmax.xlane.f32.xlu0 %v702_v13 }
 0x3ea   :  { %802 = vrot.lane.b32.xlu1 %v2088_v35, %s1969_s14 }
 0x3ee   :  { %880 = vrot.lane.b32.xlu1 %v2062_v29, %s1970_s2 }
 0x3f2   :  { %958 = vrot.lane.b32.xlu1 %v2060_v27, %s1970_s2 }
 0x3f3   :  { %725 = vrot.lane.b32.xlu0 %v2090_v37, %s1969_s14 }
 0x3f6   :  { %956 = vrot.lane.b32.xlu1 %v2068_v30, %s1970_s2 }
 0x466   :  { %v707_v14 = vpop.xlane.xlu1 %706 }
 0x467   :  { %v709_v15 = vsub.f32 %v701_v6, %v707_v14 }
 0x469   :  { %v712_v16 = vmul.f32 1.442695, %v709_v15 }
 0x46a   :  { %v803_v17 = vpop.permute.xlu1 %802  ;;  %v704_v19 = vpop.xlane.xlu0 %703 }
 0x46b   :  { %1919 = vpow2.f32 %v712_v16  ;;  %v708_v21 = vsub.f32 %v700_v11, %v704_v19  ;;  %1822 = vmatpush3.msra.mxu0 %v803_v17 }
 0x46c   :  { %1831 = vmatprep.subr.mxu0 %v1967_v18 }
 0x46d   :  { %v710_v23 = vmul.f32 1.442695, %v708_v21 }
 0x46e   :  { %v726_v24 = vpop.permute.xlu0 %725  ;;  %v881_v36 = vpop.permute.xlu1 %880 }
 0x46f   :  { %1921 = vpow2.f32 %v710_v23  ;;  %1817 = vmatpush3.msra.mxu1 %v726_v24 }
 0x470   :  { %1826 = vmatprep.subr.mxu1 %v1967_v18 }
 0x472   :  { %v959_v39 = vpop.permute.xlu1 %958 }
 0x475   :  { %v1920_v25 = vpop.eup %1919 }
 0x476   :  { %v717_v26 = vsel %vm221_vm2, %v1920_v25, 0.0  ;;  %v957_v43 = vpop.permute.xlu1 %956 }
 0x477   :  { %718 = vadd.xlane.f32.xlu0 %v717_v26 }
 0x479   :  { %v1922_v28 = vpop.eup %1921 }
 0x47a   :  { %v714_v32 = vsel %vm221_vm2, %v1922_v28, 0.0 }
 0x47b   :  { %715 = vadd.xlane.f32.xlu0 %v714_v32 }
 0x491   :  { %878 = vrot.lane.b32.xlu0 %v2073_v31, %s1970_s2 }
 0x504   :  { %v719_v33 = vpop.xlane.xlu0 %718 }
 0x505   :  { %1923 = vrcp.f32 %v719_v33 }
 0x508   :  { %v716_v34 = vpop.xlane.xlu0 %715 }
 0x509   :  { %1925 = vrcp.f32 %v716_v34 }
 0x50c   :  { %v879_v44 = vpop.permute.xlu0 %878 }
 0x50f   :  { %v1924_v38 = vpop.eup %1923 }
 0x510   :  { %v723_v40 = vmul.f32 %v1924_v38, %v1920_v25 }
 0x512   :  { %1824 = vmatmul.mubr.msk.f32.vlgmr.msra.gmra.mrb[10].mxu0 %vm221_vm2, %v723_v40 }
 0x513   :  { %v1926_v41 = vpop.eup %1925  ;;  %1832 = vmatpush3.xpose.msk.msra.mxu0 %vm221_vm2, %v959_v39  ;;  %1833 = vmatprep.mubr.msk.f32.mxu0 %vm1968_vm1, %v1967_v18 }
 0x514   :  { %v721_v42 = vmul.f32 %v1926_v41, %v1922_v28  ;;  %1841 = vmatprep.subr.mxu0 %v1967_v18 }
 0x516   :  { %1819 = vmatmul.mubr.msk.f32.vlgmr.msra.gmra.mrb[8].mxu1 %vm221_vm2, %v721_v42  ;;  %1834 = vmatmul.mubr.msk.f32.vlgmr.msra.gmra.mrb[12].mxu0 %vm221_vm2, %v957_v43 }
 0x517   :  { %1827 = vmatpush3.xpose.msk.msra.mxu1 %vm221_vm2, %v881_v36  ;;  %1828 = vmatprep.mubr.msk.f32.mxu1 %vm1968_vm1, %v1967_v18 }
 0x518   :  { %1836 = vmatprep.subr.mxu1 %v1967_v18  ;;  %1843 = vmatprep.mubr.msk.f32.mxu0 %vm1968_vm1, %v1967_v18 }
 0x51a   :  { %1829 = vmatmul.mubr.msk.f32.vlgmr.msra.gmra.mrb[10].mxu1 %vm221_vm2, %v879_v44 }
 0x51b   :  { %1838 = vmatprep.mubr.msk.f32.mxu1 %vm1968_vm1, %v1967_v18 }
 0x5e5   :  { %v2158_v45 = vpop.f32.mrb[10].mxu0 }
 0x5e6   :  { %v1825_v46 = vpop.f32.mrb[11].mxu0 }
 0x5e9   :  { %v2160_v47 = vpop.f32.mrb[8].mxu1  ;;  %v1030_v48 = vpop.f32.mrb[12].mxu0 }
 0x5ea   :  { %v1035_v49 = vmul.f32 0.35355338, %v1030_v48  ;;  %v1820_v50 = vpop.f32.mrb[9].mxu1  ;;  %v1835_v51 = vpop.f32.mrb[13].mxu0 }
 0x5eb   :  { %v29_v50 = vld [vmem:[%s2246_s1 + $0x40] sm:$0xff] }
 0x5ec   :  { %v1039_v52 = vsel %vm221_vm2, %v1035_v49, -inf }
 0x5ed   :  { %1040 = vmax.xlane.f32.xlu1 %v1039_v52  ;;  %v952_v53 = vpop.f32.mrb[10].mxu1  ;;  %v31_v52 = vld [vmem:[%s2246_s1 + $0x50] sm:$0xff] }
 0x5ee   :  { %v1034_v54 = vmul.f32 0.35355338, %v952_v53  ;;  %v1830_v55 = vpop.f32.mrb[11].mxu1  ;;  %v32_v53 = vld [vmem:[%s2246_s1 + $0x58] sm:$0xff] }
 0x5f0   :  { %v1036_v56 = vsel %vm221_vm2, %v1034_v54, -inf }
 0x5f1   :  { %1037 = vmax.xlane.f32.xlu0 %v1036_v56 }
 0x5fe   :  { %1134 = vrot.lane.b32.xlu1 %v2088_v35, %s1970_s2 }
 0x602   :  { %1212 = vrot.lane.b32.xlu1 %v2062_v29, %s1971_s15 }
 0x606   :  { %1290 = vrot.lane.b32.xlu1 %v2060_v27, %s1971_s15 }
 0x607   :  { %1058 = vrot.lane.b32.xlu0 %v2090_v37, %s1970_s2 }
 0x60a   :  { %1288 = vrot.lane.b32.xlu1 %v2068_v30, %s1971_s15 }
 0x67a   :  { %v1041_v57 = vpop.xlane.xlu1 %1040 }
 0x67b   :  { %v1043_v58 = vsub.f32 %v1035_v49, %v1041_v57 }
 0x67d   :  { %v1046_v59 = vmul.f32 1.442695, %v1043_v58 }
 0x67e   :  { %v1135_v60 = vpop.permute.xlu1 %1134  ;;  %v1038_v61 = vpop.xlane.xlu0 %1037 }
 0x67f   :  { %1927 = vpow2.f32 %v1046_v59  ;;  %v1042_v62 = vsub.f32 %v1034_v54, %v1038_v61  ;;  %1842 = vmatpush3.msra.mxu0 %v1135_v60  ;;  %v1897_v54 = vpack.c.bf16 %v32_v53, %v31_v52 }
 0x680   :  { %1851 = vmatprep.subr.mxu0 %v1967_v18 }
 0x681   :  { %v1044_v29 = vmul.f32 1.442695, %v1042_v62 }
 0x682   :  { %v1059_v63 = vpop.permute.xlu0 %1058  ;;  %v1213_v6 = vpop.permute.xlu1 %1212 }
 0x683   :  { %1929 = vpow2.f32 %v1044_v29  ;;  %1837 = vmatpush3.msra.mxu1 %v1059_v63 }
 0x684   :  { %1846 = vmatprep.subr.mxu1 %v1967_v18 }
 0x686   :  { %v1291_v8 = vpop.permute.xlu1 %1290 }
 0x689   :  { %v1928_v27 = vpop.eup %1927 }
 0x68a   :  { %v1051_v0 = vsel %vm221_vm2, %v1928_v27, 0.0 }
 0x68b   :  { %1052 = vadd.xlane.f32.xlu0 %v1051_v0 }
 0x68d   :  { %v1930_v30 = vpop.eup %1929 }
 0x68e   :  { %v1048_v1 = vsel %vm221_vm2, %v1930_v30, 0.0 }
 0x68f   :  { %1049 = vadd.xlane.f32.xlu0 %v1048_v1 }
 0x6a5   :  { %1210 = vrot.lane.b32.xlu0 %v2073_v31, %s1971_s15  ;;  %v1289_v31 = vpop.permute.xlu1 %1288 }
 0x718   :  { %v1053_v3 = vpop.xlane.xlu0 %1052 }
 0x719   :  { %1931 = vrcp.f32 %v1053_v3 }
 0x71c   :  { %v1050_v5 = vpop.xlane.xlu0 %1049 }
 0x71d   :  { %1933 = vrcp.f32 %v1050_v5 }
 0x720   :  { %v1211_v12 = vpop.permute.xlu0 %1210 }
 0x723   :  { %v1932_v7 = vpop.eup %1931 }
 0x724   :  { %v1057_v9 = vmul.f32 %v1932_v7, %v1928_v27 }
 0x726   :  { %1844 = vmatmul.mubr.msk.f32.vlgmr.msra.gmra.mrb[14].mxu0 %vm221_vm2, %v1057_v9 }
 0x727   :  { %v1934_v10 = vpop.eup %1933  ;;  %1852 = vmatpush3.xpose.msk.msra.mxu0 %vm221_vm2, %v1291_v8  ;;  %1853 = vmatprep.mubr.msk.f32.mxu0 %vm1968_vm1, %v1967_v18 }
 0x728   :  { %v1055_v11 = vmul.f32 %v1934_v10, %v1930_v30  ;;  %1861 = vmatprep.subr.mxu0 %v1967_v18 }
 0x72a   :  { %1839 = vmatmul.mubr.msk.f32.vlgmr.msra.gmra.mrb[12].mxu1 %vm221_vm2, %v1055_v11  ;;  %1854 = vmatmul.mubr.msk.f32.vlgmr.msra.gmra.mrb[16].mxu0 %vm221_vm2, %v1289_v31 }
 0x72b   :  { %1847 = vmatpush3.xpose.msk.msra.mxu1 %vm221_vm2, %v1213_v6  ;;  %1848 = vmatprep.mubr.msk.f32.mxu1 %vm1968_vm1, %v1967_v18  ;;  %v1576_v6 = vsub.s32 2, %v2051_v20 }
 0x72c   :  { %1856 = vmatprep.subr.mxu1 %v1967_v18  ;;  %1863 = vmatprep.mubr.msk.f32.mxu0 %vm1968_vm1, %v1967_v18 }
 0x72d   :  { %v1577_v7 = vrot.slane %v2057_v22, %v1576_v6 }
 0x72e   :  { %1849 = vmatmul.mubr.msk.f32.vlgmr.msra.gmra.mrb[14].mxu1 %vm221_vm2, %v1211_v12 }
 0x72f   :  { %1858 = vmatprep.mubr.msk.f32.mxu1 %vm1968_vm1, %v1967_v18 }
 0x7f9   :  { %v1206_v13 = vpop.f32.mrb[14].mxu0 }
 0x7fa   :  { %v1845_v14 = vpop.f32.mrb[15].mxu0 }
 0x7fd   :  { %v1130_v15 = vpop.f32.mrb[12].mxu1  ;;  %v1362_v16 = vpop.f32.mrb[16].mxu0 }
 0x7fe   :  { %v1367_v17 = vmul.f32 0.35355338, %v1362_v16  ;;  %v1840_v19 = vpop.f32.mrb[13].mxu1  ;;  %v1855_v21 = vpop.f32.mrb[17].mxu0 }
 0x800   :  { %v1371_v23 = vsel %vm221_vm2, %v1367_v17, -inf }
 0x801   :  { %1372 = vmax.xlane.f32.xlu1 %v1371_v23  ;;  %v1284_v24 = vpop.f32.mrb[14].mxu1 }
 0x802   :  { %v1366_v25 = vmul.f32 0.35355338, %v1284_v24  ;;  %v1850_v26 = vpop.f32.mrb[15].mxu1 }
 0x804   :  { %v1368_v28 = vsel %vm221_vm2, %v1366_v25, -inf }
 0x805   :  { %1369 = vmax.xlane.f32.xlu0 %v1368_v28 }
 0x812   :  { %1466 = vrot.lane.b32.xlu1 %v2088_v35, %s1971_s15 }
 0x816   :  { %1544 = vrot.lane.b32.xlu1 %v2160_v47, %s1972_s16 }
 0x81a   :  { %1546 = vrot.lane.b32.xlu1 %v2158_v45, %s1972_s16 }
 0x81e   :  { %1554 = vrot.lane.b32.xlu1 %v1206_v13, %s1973_s17 }
 0x88e   :  { %v1373_v18 = vpop.xlane.xlu1 %1372 }
 0x88f   :  { %v1375_v32 = vsub.f32 %v1367_v17, %v1373_v18 }
 0x891   :  { %v1378_v33 = vmul.f32 1.442695, %v1375_v32 }
 0x892   :  { %v1467_v34 = vpop.permute.xlu1 %1466  ;;  %v1370_v36 = vpop.xlane.xlu0 %1369 }
 0x893   :  { %1935 = vpow2.f32 %v1378_v33  ;;  %v1374_v38 = vsub.f32 %v1366_v25, %v1370_v36  ;;  %1862 = vmatpush3.msra.mxu0 %v1467_v34 }
 0x895   :  { %v1376_v39 = vmul.f32 1.442695, %v1374_v38 }
 0x896   :  { %v1545_v59 = vpop.permute.xlu1 %1544 }
 0x897   :  { %1937 = vpow2.f32 %v1376_v39  ;;  %v1566_v29 = vsel %vm221_vm2, %v2122_v4, %v1545_v59 }
 0x89a   :  { %v1547_v60 = vpop.permute.xlu1 %1546 }
 0x89b   :  { %v1567_v27 = vsel %vm221_vm2, %v2120_v2, %v1547_v60 }
 0x89d   :  { %v1936_v35 = vpop.eup %1935 }
 0x89e   :  { %v1383_v40 = vsel %vm221_vm2, %v1936_v35, 0.0  ;;  %v1555_v61 = vpop.permute.xlu1 %1554 }
 0x89f   :  { %1384 = vadd.xlane.f32.xlu0 %v1383_v40  ;;  %v1570_v1 = vsel %vm1568_vm3, %v1567_v27, %v1555_v61 }
 0x8a1   :  { %v1938_v41 = vpop.eup %1937 }
 0x8a2   :  { %v1380_v42 = vsel %vm221_vm2, %v1938_v41, 0.0 }
 0x8a3   :  { %1381 = vadd.xlane.f32.xlu0 %v1380_v42 }
 0x8b9   :  { %1390 = vrot.lane.b32.xlu0 %v2090_v37, %s1971_s15  ;;  %v30_v37 = vld [vmem:[%s2246_s1 + $0x48] sm:$0xff]  ;;  %s1975_s1 = smov [#allocation2]  }
 0x8ba   :  { %v1893_v51 = vpack.c.bf16 %v30_v37, %v29_v50  ;;  %s1666_s27 = sshll.u32 %s1975_s1, 4  ;;  %s1667_s27 = int_to_ptr.vmem [resolvable:$true] %s1666_s27 }
 0x8bb   :  { %s1943_s28 = scalar_lea.vmem %s1667_s27, 256  ;;  %p1948_p1 = scmp.lt.s32.totalorder %s1667_s27, %s1667_s27 }
 0x8bc   :  { %p1944_p0 = scmp.ne.s32.totalorder %s1667_s27, %s1943_s28  ;;  %p1949_p2 = scmp.lt.s32.totalorder %s1943_s28, %s1943_s28 }
 0x8bd   :  { %1552 = vrot.lane.b32.xlu0 %v1130_v15, %s1973_s17 }
 0x8be   :  { %p1950_p3 = por %p1949_p2, %p1948_p1 }
 0x8c0   :  { %p1951_p4 = pnand %p1950_p3, %p1944_p0 }
 0x92c   :  { %v1385_v43 = vpop.xlane.xlu0 %1384 }
 0x92d   :  { %1939 = vrcp.f32 %v1385_v43 }
 0x930   :  { %v1382_v44 = vpop.xlane.xlu0 %1381 }
 0x931   :  { %1941 = vrcp.f32 %v1382_v44 }
 0x934   :  { %v1391_v45 = vpop.permute.xlu0 %1390 }
 0x935   :  { %1857 = vmatpush3.msra.mxu1 %v1391_v45 }
 0x936   :  { %1894 = vmatprep.subr.bf16.mxu1 %v1893_v51 }
 0x937   :  { %v1940_v46 = vpop.eup %1939 }
 0x938   :  { %v1389_v47 = vmul.f32 %v1940_v46, %v1936_v35  ;;  %v1553_v62 = vpop.permute.xlu0 %1552 }
 0x939   :  { %v1569_v0 = vsel %vm1568_vm3, %v1566_v29, %v1553_v62 }
 0x93a   :  { %1864 = vmatmul.mubr.msk.f32.vlgmr.msra.gmra.mrb[18].mxu0 %vm221_vm2, %v1389_v47 }
 0x93b   :  { %v1942_v48 = vpop.eup %1941 }
 0x93c   :  { %v1387_v49 = vmul.f32 %v1942_v48, %v1938_v41 }
 0x93e   :  { %1859 = vmatmul.mubr.msk.f32.vlgmr.msra.gmra.mrb[16].mxu1 %vm221_vm2, %v1387_v49 }
 0x93f   :  { %1896 = vmatpush3.bf16.msra.mxu1 %v1893_v51 }
 0x940   :  { %1898 = vmatprep.subr.bf16.mxu1 %v1897_v54 }
 0x943   :  { %1900 = vmatpush3.bf16.msra.mxu1 %v1897_v54 }
 0xa0d   :  { %v1538_v55 = vpop.f32.mrb[18].mxu0 }
 0xa0e   :  { %1562 = vrot.lane.b32.xlu1 %v1538_v55, %s1974_s26  ;;  %v1865_v56 = vpop.f32.mrb[19].mxu0 }
 0xa11   :  { %v1462_v57 = vpop.f32.mrb[16].mxu1 }
 0xa12   :  { %1560 = vrot.lane.b32.xlu0 %v1462_v57, %s1974_s26  ;;  %v1860_v58 = vpop.f32.mrb[17].mxu1 }
 0xa80   :  { %v1563_v63 = vpop.permute.xlu1 %1562 }
 0xa81   :  { %v1573_v5 = vsel %vm1571_vm4, %v1570_v1, %v1563_v63 }
 0xa84   :  { %v1561_v30 = vpop.permute.xlu0 %1560 }
 0xa85   :  { %v1572_v3 = vsel %vm1571_vm4, %v1569_v0, %v1561_v30 }
 0xa86   :  { %1874 = vmatprep.mubr.msk.f32.mxu1 %vm38_vm0, %v1572_v3 }
 0xa87   :  { %1875 = vmatmul.mubr.msk.f32.vlgmr.msra.gmra.mrb[18].mxu1 %vm38_vm0, %v1573_v5 }
 0xb5a   :  { %v1876_v4 = vpop.f32.mrb[18].mxu1 }
 0xb5b   :  { %v1656_v8 = vadd.f32 %v1876_v4, %v1577_v7  ;;  %v1650_v9 = vpop.f32.mrb[19].mxu1 }
 0xb5c   :  { %v1651_v10 = vadd.f32 %v1650_v9, %v1577_v7 }
 0xb5d   :  { %1660 = vst.msk [vmem:[#allocation2 + $0x8] sm:$0xff] %vm38_vm0, %v1656_v8 }
 0xb5e   :  { %1659 = vst.msk [vmem:[#allocation2] sm:$0xff] %vm38_vm0, %v1651_v10 }
 0xb5f   :  { %1954 = shalt.err (!%p1951_p4)
}
 0xb60   :  { %s1955_s4 = scalar_lea.hbm %s2248_s3, 256 }
 0xb61   :  { %p1956_p5 = scmp.ne.s32.totalorder %s2248_s3, %s1955_s4  ;;  %p1959_p6 = scmp.lt.u32.totalorder %s1955_s4, %s2248_s3 }
 0xb63   :  { %p1961_p7 = pnand %p1959_p6, %p1956_p5 }
 0xb65   :  { %1964 = shalt.err (!%p1961_p7)
}
 0xb66   :  { %s1976_s9 = smov 128  }
 0xb67   :  { %1672 = dma.vmem_to_hbm [thread:$0]  %s1667_s27, 256, %s2248_s3, [#allocation3], %s1976_s9, %s1976_s9, %s1972_s16  }
 0xb68   :  { %1965 = dma.done.wait [#allocation3], 256  }
 0xb69   :  { %1966 = vsyncadd [#allocation3], 4294967040 }
 0xb6a   :  { %1676 = vsyncpa [#allocation3], 1 }

</bundles_post_ra>
